<compile_context>
chip_gen: v7x
topology: tpu7x:2x2x1
jax: 0.10.0
libtpu: 0.0.40
codegen_flags: <defaults>
</compile_context>

<pallas_src>
import jax
import jax.numpy as jnp
from jax.experimental import pallas as pl
from jax.experimental.pallas import tpu as pltpu

_LANE = 128  # lane width: pad Cout / Wo to multiples of this for dense stores


def _round_up(x, m):
    return ((x + m - 1) // m) * m


def _pick_tm(M):
    """Row-tile size for the patch-embed matmul.

    Prefer the largest tile in {1024,...,16} that (a) yields >= 2 grid steps so
    v7x's two TensorCores both get work, and (b) keeps M-padding waste < 12.5%.
    Tiles are multiples of 16 (bf16 sublane packing)."""
    for tm in (1024, 512, 256, 128, 64, 32, 16):
        Mp = _round_up(M, tm)
        if Mp // tm >= 2 and (Mp - M) <= max(M // 8, 0):
            return tm
    return 16


# ----------------------------- Pallas kernels ------------------------------ #

def _patch_embed_kernel(p_ref, w_ref, b_ref, o_ref):
    # p_ref: (TM, K=64) bf16 patches, w_ref: (K, Cp=128) bf16, b_ref: (1, Cp) f32
    # o_ref: (TM, Cp) bf16  (lane-dense; bf16 output halves HBM store bytes)
    acc = jnp.dot(p_ref[...], w_ref[...], preferred_element_type=jnp.float32)
    acc = acc + b_ref[...]                       # broadcast bias over TM rows
    o_ref[...] = jnp.maximum(acc, 0.0).astype(o_ref.dtype)


def _mask_interp_kernel(m_ref, sh_ref, swt_ref, o_ref):
    # Batched over Nb images per grid step:
    #   m_ref:  (Nb, H, W)   bf16 mask
    #   sh_ref: (Ho, H)      bf16 one-hot row selector
    #   swt_ref:(W, Wop)     bf16 one-hot col selector (transposed, lane-padded to 128)
    #   o_ref:  (Nb, Ho, Wop) int8 (thresholded in-kernel; host-side slice + bool cast)
    nb = m_ref.shape[0]
    # column selection first: natural dot_general order, no in-kernel transpose
    u = jnp.einsum('nhw,wp->nhp', m_ref[...], swt_ref[...],
                   preferred_element_type=jnp.float32)               # (Nb, H, Wop)
    # row selection as a batched matmul (broadcast the tiny one-hot over the batch)
    shb = jnp.broadcast_to(sh_ref[...], (nb,) + sh_ref.shape)         # (Nb, Ho, H)
    r = jnp.einsum('noh,nhp->nop', shb, u.astype(swt_ref.dtype),
                   preferred_element_type=jnp.float32)                # (Nb, Ho, Wop)
    o_ref[...] = (r > 0.5).astype(o_ref.dtype)


# ------------------------------ wrappers ----------------------------------- #

def patch_embed(patches_bf16, w_bf16, b_f32, tm):
    """Tiled (over M) bf16 matmul + bias + ReLU on the MXU; bf16 output."""
    Mp, K = patches_bf16.shape
    Cp = w_bf16.shape[1]
    grid = (Mp // tm,)
    return pl.pallas_call(
        _patch_embed_kernel,
        out_shape=jax.ShapeDtypeStruct((Mp, Cp), jnp.bfloat16),
        grid_spec=pltpu.PrefetchScalarGridSpec(
            num_scalar_prefetch=0,
            grid=grid,
            # K (=64) equals the full array dim, so the (8,128) BlockSpec rule is met
            # without padding K in HBM — the MXU pads the contraction dim for free.
            in_specs=[pl.BlockSpec((tm, K), lambda i: (i, 0)),    # patches tile
                      pl.BlockSpec((K, Cp), lambda i: (0, 0)),    # full weights
                      pl.BlockSpec((1, Cp), lambda i: (0, 0))],   # bias row
            out_specs=pl.BlockSpec((tm, Cp), lambda i: (i, 0)),
        ),
        compiler_params=pltpu.CompilerParams(
            # M-tiles are independent -> shard across v7x's 2 TensorCores.
            dimension_semantics=("parallel",),
            # Even at tm=1024 the double-buffered working set is < 1 MiB; 32 MiB scoped
            # VMEM is comfortably inside every generation (incl. v7x's 64 MiB physical).
            vmem_limit_bytes=32 * 1024 * 1024,
        ),
    )(patches_bf16, w_bf16, b_f32)


def mask_interpolate_nearest(mask_bool, out_hw):
    """F.interpolate(m[None].float(), size=out_hw)[0].to(bool)  (mode='nearest')."""
    N, H, W = mask_bool.shape
    Ho, Wo = out_hw
    # PyTorch nearest: src = floor(dst * in/out); integer math avoids fp off-by-one.
    idx_h = jnp.clip((jnp.arange(Ho) * H) // Ho, 0, H - 1)
    idx_w = jnp.clip((jnp.arange(Wo) * W) // Wo, 0, W - 1)
    sh = jax.nn.one_hot(idx_h, H, dtype=jnp.bfloat16)                      # (Ho, H)
    Wop = _round_up(Wo, _LANE)                                             # lane-dense out
    swt = jnp.zeros((W, Wop), jnp.bfloat16).at[:, :Wo].set(
        jax.nn.one_hot(idx_w, W, dtype=jnp.bfloat16).T)                    # (W, Wop)

    # Batch Nb images per grid step: per-image work is tiny, so the ~0.35 us fixed
    # per-grid-step cost dominates; 2 grid steps still feed both v7x TensorCores.
    G = 2 if N >= 2 else 1
    Nb = -(-N // G)
    Np = G * Nb
    m_bf = mask_bool.astype(jnp.bfloat16)
    if Np != N:
        m_bf = jnp.pad(m_bf, ((0, Np - N), (0, 0), (0, 0)))

    out_i8 = pl.pallas_call(
        _mask_interp_kernel,
        out_shape=jax.ShapeDtypeStruct((Np, Ho, Wop), jnp.int8),
        grid_spec=pltpu.PrefetchScalarGridSpec(
            num_scalar_prefetch=0,
            grid=(G,),
            in_specs=[pl.BlockSpec((Nb, H, W), lambda g: (g, 0, 0)),
                      pl.BlockSpec((Ho, H), lambda g: (0, 0)),
                      pl.BlockSpec((W, Wop), lambda g: (0, 0))],
            out_specs=pl.BlockSpec((Nb, Ho, Wop), lambda g: (g, 0, 0)),
        ),
        compiler_params=pltpu.CompilerParams(
            dimension_semantics=("parallel",),
        ),
    )(m_bf, sh, swt)
    return out_i8[:N, :, :Wo].astype(jnp.bool_)                            # .to(torch.bool)


class BackboneBasePallas:
    """JAX/Pallas re-implementation of BackboneBase.forward semantics."""

    def __init__(self, in_channels=4, num_channels=32, patch=4, key=jax.random.PRNGKey(0)):
        kw, kb = jax.random.split(key)
        self.patch = patch
        self.num_channels = num_channels
        K = in_channels * patch * patch
        self.K = K                                   # contraction dim, NOT padded in HBM
        self.Cp = _round_up(num_channels, _LANE)     # pad output channels to 128 (lane-dense)
        # synthetic "body": one strided conv (patch embedding) + ReLU, deterministic init
        w = jax.random.normal(kw, (num_channels, in_channels, patch, patch), jnp.float32) * 0.05
        b = jax.random.normal(kb, (num_channels,), jnp.float32) * 0.05
        w2d = jnp.transpose(w.reshape(num_channels, K))                    # (K, Cout)
        self.w2d = jnp.pad(
            w2d, ((0, 0), (0, self.Cp - num_channels))).astype(jnp.bfloat16)      # (K, Cp)
        self.b2d = jnp.pad(
            b.reshape(1, num_channels), ((0, 0), (0, self.Cp - num_channels))).astype(jnp.float32)

    def body(self, x):                                       # x: NCHW
        N, C, H, W = x.shape
        k = self.patch
        Ho, Wo = H // k, W // k
        M = N * Ho * Wo
        # im2col glue (single fused XLA copy): NCHW -> (M, C*k*k) bf16, ordering (C, kh, kw).
        # No K padding (cuts the input stream + this write ~2x vs the padded version).
        p = (x.reshape(N, C, Ho, k, Wo, k)
              .transpose(0, 2, 4, 1, 3, 5)
              .reshape(M, self.K)
              .astype(jnp.bfloat16))
        tm = _pick_tm(M)
        Mp = _round_up(M, tm)
        if Mp != M:
            p = jnp.pad(p, ((0, Mp - M), (0, 0)))
        f = patch_embed(p, self.w2d, self.b2d, tm)            # (Mp, Cp) bf16 Pallas hot path
        # slice off padding, restore PyTorch NCHW f32 feature layout
        f = (f[:M, :self.num_channels].astype(jnp.float32)
             .reshape(N, Ho, Wo, self.num_channels)
             .transpose(0, 3, 1, 2))
        return {"0": f}

    def forward(self, tensors, mask):
        xs = self.body(tensors)
        out = {}
        for name, x in xs.items():
            assert mask is not None
            m = mask_interpolate_nearest(mask, x.shape[-2:])  # Pallas nearest-interp
            out[name] = (x, m)                                # NestedTensor(x, mask)
        return out


# ------------------------------- main --------------------------------------- #

if __name__ == "__main__":
    key = jax.random.PRNGKey(0)
    k_img, k_par = jax.random.split(key)

    N, C, H, W = 2, 4, 16, 16
    tensors = jax.random.normal(k_img, (N, C, H, W), jnp.float32)       # NCHW
    # DETR-style padding mask: True where padded
    hh = jnp.arange(H)[None, :, None]
    ww = jnp.arange(W)[None, None, :]
    valid_h = jnp.array([16, 12])[:, None, None]
    valid_w = jnp.array([16, 10])[:, None, None]
    mask = (hh >= valid_h) | (ww >= valid_w)                            # (N, H, W) bool

    backbone = BackboneBasePallas(in_channels=C, num_channels=32, patch=4, key=k_par)
    out = backbone.forward(tensors, mask)
    feats, out_mask = out["0"]
    jax.block_until_ready(feats)
    jax.block_until_ready(out_mask)

    # pure-JAX reference check (same bf16-in / f32-accumulate / bf16-out recipe)
    k = backbone.patch
    Ho, Wo = H // k, W // k
    Kfull = C * k * k
    p_ref = (tensors.reshape(N, C, Ho, k, Wo, k)
             .transpose(0, 2, 4, 1, 3, 5)
             .reshape(N * Ho * Wo, Kfull)
             .astype(jnp.bfloat16))
    f_full = jnp.maximum(
        jnp.dot(p_ref, backbone.w2d, preferred_element_type=jnp.float32) + backbone.b2d, 0.0)
    f_full = f_full.astype(jnp.bfloat16).astype(jnp.float32)            # kernel stores bf16
    f_ref = (f_full[:, :backbone.num_channels]
             .reshape(N, Ho, Wo, backbone.num_channels)
             .transpose(0, 3, 1, 2))
    idx_h = jnp.clip((jnp.arange(Ho) * H) // Ho, 0, H - 1)
    idx_w = jnp.clip((jnp.arange(Wo) * W) // Wo, 0, W - 1)
    m_ref = mask[:, idx_h][:, :, idx_w]

    assert feats.shape == (N, 32, Ho, Wo) and feats.dtype == jnp.float32
    assert out_mask.shape == (N, Ho, Wo) and out_mask.dtype == jnp.bool_
    assert jnp.allclose(feats, f_ref, atol=2e-2, rtol=2e-2)
    assert bool(jnp.array_equal(out_mask, m_ref))

    print("KERNEL_OK")
</pallas_src>

<mosaic_0001>
module attributes {stable_mosaic.version = 11 : i64} {
  func.func @_patch_embed_kernel(%arg0: i32, %arg1: memref<16x64xbf16, #tpu.memory_space<vmem>>, %arg2: memref<64x128xbf16, #tpu.memory_space<vmem>>, %arg3: memref<1x128xf32, #tpu.memory_space<vmem>>, %arg4: memref<16x128xbf16, #tpu.memory_space<vmem>>) attributes {dimension_semantics = [#tpu.dimension_semantics<parallel>], iteration_bounds = array<i64: 2>, scalar_prefetch = 0 : i64, scratch_operands = 0 : i64, tpu.core_type = #tpu.core_type<tc>, window_params = [{transform_indices = @transform_0, window_bounds = array<i64: 16, 64>}, {pipeline_mode = #tpu.pipeline_mode<synchronous>, transform_indices = @transform_1, window_bounds = array<i64: 64, 128>}, {pipeline_mode = #tpu.pipeline_mode<synchronous>, transform_indices = @transform_2, window_bounds = array<i64: 1, 128>}, {transform_indices = @transform_3, window_bounds = array<i64: 16, 128>}]} {
    %c0 = arith.constant 0 : index
    %c0_0 = arith.constant 0 : index
    %0 = vector.load %arg1[%c0, %c0_0] : memref<16x64xbf16, #tpu.memory_space<vmem>>, vector<16x64xbf16>
    %c0_1 = arith.constant 0 : index
    %c0_2 = arith.constant 0 : index
    %1 = vector.load %arg2[%c0_1, %c0_2] : memref<64x128xbf16, #tpu.memory_space<vmem>>, vector<64x128xbf16>
    %cst = arith.constant dense<0.000000e+00> : vector<16x128xf32>
    %2 = tpu.matmul %0, %1, %cst {dimension_numbers = #tpu.dot_dimension_numbers<[1], [0], [0], [1], [0, 0, 1, 1], [], []>} : vector<16x64xbf16>, vector<64x128xbf16>, vector<16x128xf32> -> vector<16x128xf32>
    %c0_3 = arith.constant 0 : index
    %c0_4 = arith.constant 0 : index
    %3 = vector.load %arg3[%c0_3, %c0_4] : memref<1x128xf32, #tpu.memory_space<vmem>>, vector<1x128xf32>
    %4 = vector.broadcast %3 : vector<1x128xf32> to vector<16x128xf32>
    %5 = arith.addf %2, %4 : vector<16x128xf32>
    %cst_5 = arith.constant 0.000000e+00 : f32
    %6 = vector.broadcast %cst_5 : f32 to vector<16x128xf32>
    %7 = arith.maximumf %5, %6 : vector<16x128xf32>
    %8 = arith.truncf %7 : vector<16x128xf32> to vector<16x128xbf16>
    %c0_6 = arith.constant 0 : index
    %c0_7 = arith.constant 0 : index
    %9 = vector.load %arg4[%c0_6, %c0_7] : memref<16x128xbf16, #tpu.memory_space<vmem>>, vector<16x128xbf16>
    tpu.vector_store %arg4[%c0_6, %c0_7], %8 {strides = array<i32>} : memref<16x128xbf16, #tpu.memory_space<vmem>>, vector<16x128xbf16>,
    return
  }
  func.func @transform_0(%arg0: i32) -> (i32, i32) {
    %c0_i32 = arith.constant 0 : i32
    %c0_i32_0 = arith.constant 0 : i32
    return %arg0, %c0_i32 : i32, i32
  }
  func.func @transform_1(%arg0: i32) -> (i32, i32) {
    %c0_i32 = arith.constant 0 : i32
    %c0_i32_0 = arith.constant 0 : i32
    %c0_i32_1 = arith.constant 0 : i32
    return %c0_i32, %c0_i32_0 : i32, i32
  }
  func.func @transform_2(%arg0: i32) -> (i32, i32) {
    %c0_i32 = arith.constant 0 : i32
    %c0_i32_0 = arith.constant 0 : i32
    %c0_i32_1 = arith.constant 0 : i32
    return %c0_i32, %c0_i32_0 : i32, i32
  }
  func.func @transform_3(%arg0: i32) -> (i32, i32) {
    %c0_i32 = arith.constant 0 : i32
    %c0_i32_0 = arith.constant 0 : i32
    return %arg0, %c0_i32 : i32, i32
  }
}

</mosaic_0001>

<bundles_post_ra>
// kernel: tpu_custom_call.1
= control target key start
LH: loop header
LB: loop body
LE: loop exit
PB: predicated region body
PF: predicated region fallthrough
CT: control target
= control target key end

     0   :  { %8 = vsyncpa [#allocation3], 0  ;;  %s895_s0 = inlined_call_operand.hbm [shape: bf16[32,64], index: 0, kind: input, shape index: {}]   ;;  %s896_s1 = inlined_call_operand.hbm [shape: bf16[64,128], index: 1, kind: input, shape index: {}]   ;;  %s897_s2 = inlined_call_operand.vmem [shape: f32[1,128], index: 2, kind: input, shape index: {}]   ;;  %s898_s3 = inlined_call_operand.hbm [shape: bf16[32,128], index: 3, kind: output, shape index: {}]  }
   0x1   :  { %10 = vsyncpa [#allocation3 + $0x1], 0 }
   0x2   :  { %11 = vsyncpa [#allocation6], 0 }
   0x3   :  { %12 = vsyncpa [#allocation4], 0 }
   0x4   :  { %14 = vsyncpa [#allocation4 + $0x1], 0  ;;  %s685_s12 = smov 0   ;;  %s687_s13 = smov 0  }
   0x5   :  { %s689_s14 = smov 0   ;;  %s691_s15 = smov 0  }
   0x6 LB: > { %s706_s16 = sadd.s32 4294967295, %s654_s15   ;;  %s407_s17 = sadd.s32 4294967294, %s654_s15   ;;  %s654_s15 = sphi %s691_s15, %s918_s15   ;;  %s650_s14 = sphi %s689_s14, %s917_s14   ;;  %s646_s13 = sphi %s687_s13, %s916_s13   ;;  %s642_s12 = sphi %s685_s12, %s915_s12  }
   0x7   : > { %p40_p0 = scmp.ne.s32.totalorder %s646_s13, %s642_s12  ;;  %p899_p1 = scmp.eq.s32.totalorder %s706_s16, 0 }
   0x8   : > { %p112_p3 = scmp.eq.s32.totalorder %s407_s17, 1  ;;  %p408_p5 = scmp.ge.s32.totalorder %s654_s15, 1 }
   0x9   : > { %p715_p4 = por %p899_p1, %p40_p0  ;;  %p119_p7 = scmp.lt.s32.totalorder %s654_s15, 3 }
   0xa   : > { %p720_p6 = por %p112_p3, %p40_p0  ;;  %s656_s21 = smov [#allocation5]  }
   0xb   : > { %s902_s18 = scalar_select %p715_p4, 1, 0 }
   0xc   : > { %s903_s19 = scalar_select %p720_p6, 1, 0 }
   0xd   : > { %p725_p8 = pnand %p408_p5, %p119_p7  ;;  %s131_s22 = sshll.u32 %s656_s21, 4  ;;  %s729_s22 = int_to_ptr.vmem [resolvable:$true] %s131_s22 }
   0xe   : > { %s741_s24 = sadd.s32 1, %s654_s15   ;;  %s27_s25 = sadd.s32 1, %s650_s14 }
   0xf   : > { %s904_s20 = scalar_select %p725_p8, 1, 0 }
  0x10   : > { %p466_p9 = pneg %p725_p8  ;;  %s24_s26 = ssub.s32 %s654_s15, %s741_s24 }
  0x11   : > { %s526_s29 = scalar_lea.hbm %s896_s1, 512 }
  0x12   : > { %p736_p11 = pnand %p466_p9, %p899_p1  ;;  %p527_p12 = scmp.ne.s32.totalorder %s896_s1, %s526_s29 }
  0x13   : > { %p533_p5 = scmp.lt.u32.totalorder %s526_s29, %s896_s1 }
  0x14   : > { %p528_p13 = pneg %p736_p11 }
  0x16   : > { %p529_p0 = pnand %p528_p13, %p527_p12 }
  0x18   : > { %p530_p3 = pneg %p529_p0 }
  0x1a   : > { %p535_p7 = pnand %p533_p5, %p530_p3 }
  0x1c   : > { %538 = shalt.err (!%p535_p7)
}
  0x1d   : > { %s539_s7 = scalar_lea.vmem %s729_s22, 512  ;;  %p547_p2 = scmp.lt.s32.totalorder %s729_s22, %s729_s22 }
  0x1e   : > { %p540_p9 = scmp.ne.s32.totalorder %s729_s22, %s539_s7  ;;  %p548_p6 = scmp.lt.s32.totalorder %s539_s7, %s539_s7 }
  0x20   : > { %p542_p10 = pnand %p540_p9, %p528_p13  ;;  %p549_p4 = por %p548_p6, %p547_p2 }
  0x22   : > { %p543_p1 = pneg %p542_p10 }
  0x24   : > { %p550_p8 = pnand %p549_p4, %p543_p1 }
  0x26   : > { %553 = shalt.err (!%p550_p8)
}
  0x27   : > { %s657_s8 = smov 64   ;;  %s658_s9 = smov 4  }
  0x28   : > { %469 = dma.hbm_to_vmem [thread:$0]  (!%p736_p11), %s896_s1, 512, %s729_s22, [#allocation6], %s657_s8, %s657_s8, %s658_s9  }
  0x29   : > { %p25_p1 = scmp.eq.s32.totalorder %s24_s26, 0  ;;  %p34_p2 = scmp.ne.s32.totalorder %s650_s14, %s646_s13 }
  0x2a   : > { %p35_p4 = scmp.eq.s32.totalorder %s654_s15, 0  ;;  %p479_p6 = scmp.lt.s32.totalorder %s654_s15, 2 }
  0x2b   : > { %s775_s17 = scalar_select %p25_p1, %s650_s14, %s27_s25  }
  0x2c   : > { %p36_p8 = por %p35_p4, %p34_p2  ;;  %p906_p10 = scmp.eq.s32.totalorder %s706_s16, 1 }
  0x2d   : > { %s148_s23 = sand.u32 1, %s650_s14   ;;  %s432_s27 = sshll.u32 %s654_s15, 7 }
  0x2e   : > { %p779_p12 = por %p906_p10, %p34_p2  ;;  %s411_s28 = sshll.u32 %s148_s23, 3 }
  0x2f   : > { %s788_s4 = scalar_lea.hbm %s895_s0, %s432_s27  ;;  %s152_s22 = scalar_lea.vmem [#allocation2], %s411_s28 }
  0x30   : > { %s159_s25 = sshll.u32 %s152_s22, 4  ;;  %p790_p11 = pnand %p479_p6, %p36_p8  ;;  %s794_s25 = int_to_ptr.vmem [resolvable:$true] %s159_s25 }
  0x31   : > { %s796_s5 = scalar_lea.sflag [#allocation3], %s148_s23  ;;  %s554_s6 = scalar_lea.hbm %s788_s4, 128 }
  0x32   : > { %p555_p13 = scmp.ne.s32.totalorder %s788_s4, %s554_s6  ;;  %p556_p0 = pneg %p790_p11 }
  0x33   : > { %s559_s11 = scalar_lea.hbm %s895_s0, 256  ;;  %p560_p7 = scmp.lt.u32.totalorder %s788_s4, %s895_s0 }
  0x34   : > { %p557_p3 = pnand %p556_p0, %p555_p13  ;;  %p561_p9 = scmp.lt.u32.totalorder %s559_s11, %s554_s6 }
  0x35   : > { %p563_p2 = scmp.lt.u32.totalorder %s554_s6, %s788_s4 }
  0x36   : > { %p558_p5 = pneg %p557_p3  ;;  %p562_p1 = por %p561_p9, %p560_p7 }
  0x38   : > { %p564_p4 = por %p563_p2, %p562_p1 }
  0x3a   : > { %p565_p6 = pnand %p564_p4, %p558_p5 }
  0x3c   : > { %568 = shalt.err (!%p565_p6)
}
  0x3d   : > { %s569_s23 = scalar_lea.vmem %s794_s25, 128  ;;  %s659_s29 = smov [#allocation2]  }
  0x3e   : > { %p570_p8 = scmp.ne.s32.totalorder %s794_s25, %s569_s23  ;;  %s574_s30 = sshll.u32 %s659_s29, 4  ;;  %s575_s30 = int_to_ptr.vmem [resolvable:$false] %s574_s30 }
  0x3f   : > { %s576_s22 = scalar_lea.vmem %s575_s30, 256  ;;  %p577_p3 = scmp.lt.s32.totalorder %s794_s25, %s575_s30 }
  0x40   : > { %p572_p10 = pnand %p570_p8, %p556_p0  ;;  %p578_p7 = scmp.lt.s32.totalorder %s576_s22, %s569_s23 }
  0x42   : > { %p573_p13 = pneg %p572_p10  ;;  %p579_p9 = por %p578_p7, %p577_p3 }
  0x44   : > { %p580_p1 = pnand %p579_p9, %p573_p13 }
  0x46   : > { %583 = shalt.err (!%p580_p1)
}
  0x47   : > { %473 = dma.hbm_to_vmem [thread:$0]  (!%p790_p11), %s788_s4, 128, %s794_s25, %s796_s5, %s657_s8, %s657_s8, %s658_s9  }
  0x48   : > { %p909_p0 = scmp.ne.s32.totalorder %s904_s20, 0 }
  0x49   : > { %s830_s6 = sand.u32 (!%p909_p0), 1, %s646_s13   ;;  %p910_p5 = scmp.ne.s32.totalorder (!%p909_p0), %s902_s18, 0 }
  0x4a   : > { %171 = sbr.rel (%p909_p0) target bundleno = 337 (0x151), region = 32  ;;  %s415_s7 = sshll.u32 (!%p909_p0), %s830_s6, 3 }
  0x4b   : > { %s174_s10 = scalar_lea.sflag (!%p909_p0), [#allocation3], %s830_s6  ;;  %s177_s11 = scalar_lea.vmem (!%p909_p0), [#allocation2], %s415_s7 }
  0x51   : > { %629 = dma.done.wait (%p910_p5), %s174_s10, 128  }
  0x52   : > { %631 = vsyncadd (%p910_p5), %s174_s10, 4294967168  ;;  %p911_p2 = scmp.eq.s32.totalorder %s706_s16, 0 }
  0x54   : > { %633 = dma.done.wait (%p911_p2), [#allocation6], 512   ;;  %p912_p11 = pmov %p911_p2 }
  0x55   : > { %v660_v0 = vmov 0.0   ;;  %vm661_vm0 = vmmov 0   ;;  %v521_v1 = vld [vmem:[#allocation5] sm:$0xff]   ;;  %v522_v2 = vld [vmem:[#allocation5 + $0x8] sm:$0xff]   ;;  %v523_v3 = vld [vmem:[#allocation5 + $0x10] sm:$0xff]   ;;  %vm253_vm1 = vcmask 523264  }
  0x56   : > { %635 = vsyncadd (%p912_p11), [#allocation6], 4294966784  ;;  %446 = vmatprep.subr.bf16.mxu0 %v660_v0  ;;  %454 = vmatprep.mubr.msk.bf16.mxu0 %vm661_vm0, %v660_v0  ;;  %v524_v4 = vld [vmem:[#allocation5 + $0x18] sm:$0xff]   ;;  %v418_v6 = vld [vmem:[%s897_s2] ss:$0 sm:$0xff]  ;;  %s203_s8 = scalar_lea.vmem [#allocation7], %s415_s7 }
  0x57   : > { %447 = vmatpush3.bf16.msra.mxu0 %v521_v1  ;;  %v525_v5 = vld [vmem:[%s177_s11] sm:$0xff]   ;;  %s324_s9 = sshll.u32 %s203_s8, 4  ;;  %s435_s4 = sshll.u32 %s706_s16, 7  ;;  %s846_s9 = int_to_ptr.vmem [resolvable:$true] %s324_s9 }
  0x58   : > { %448 = vmatprep.subr.bf16.mxu0 %v660_v0  ;;  %s851_s5 = scalar_lea.hbm %s898_s3, %s435_s4  ;;  %s311_s27 = scalar_lea.sflag [#allocation4], %s830_s6 }
  0x59   : > { %s584_s28 = scalar_lea.vmem %s846_s9, 128  ;;  %s662_s16 = smov [#allocation7]  }
  0x5a   : > { %p585_p4 = scmp.ne.s32.totalorder %s846_s9, %s584_s28  ;;  %s588_s23 = sshll.u32 %s662_s16, 4  ;;  %s589_s23 = int_to_ptr.vmem [resolvable:$false] %s588_s23 }
  0x5b   : > { %449 = vmatpush3.bf16.msra.mxu0 %v522_v2  ;;  %s590_s29 = scalar_lea.vmem %s589_s23, 256  ;;  %p591_p10 = scmp.lt.s32.totalorder %s846_s9, %s589_s23 }
  0x5c   : > { %450 = vmatprep.subr.bf16.mxu0 %v660_v0  ;;  %p586_p6 = pnand %p585_p4, %p779_p12  ;;  %p592_p13 = scmp.lt.s32.totalorder %s590_s29, %s584_s28 }
  0x5e   : > { %p587_p8 = pneg %p586_p6  ;;  %p593_p3 = por %p592_p13, %p591_p10 }
  0x5f   : > { %451 = vmatpush3.bf16.msra.mxu0 %v523_v3 }
  0x60   : > { %452 = vmatprep.subr.bf16.mxu0 %v660_v0  ;;  %p594_p7 = pnand %p593_p3, %p587_p8 }
  0x63   : > { %453 = vmatpush3.bf16.msra.mxu0 %v524_v4 }
  0x66   : > { %455 = vmatmul.mubr.msk.bf16.vlgmr.msra.gmra.mrb[0].mxu0 %vm253_vm1, %v525_v5 }
 0x139   : > { %v291_v7 = vpop.f32.mrb[0].mxu0 }
 0x13a   : > { %v292_v8 = vadd.f32 %v418_v6, %v291_v7  ;;  %v456_v9 = vpop.f32.mrb[1].mxu0 }
 0x13b   : > { %v294_v10 = vpop.f32.mrb[2].mxu0 }
 0x13c   : > { %v295_v11 = vadd.f32 %v418_v6, %v294_v10  ;;  %v457_v12 = vpop.f32.mrb[3].mxu0  ;;  %v298_v13 = vmax.f32 %v292_v8, 0.0 }
 0x13e   : > { %v299_v14 = vmax.f32 %v295_v11, 0.0 }
 0x140   : > { %v439_v15 = vpack.c.bf16 %v299_v14, %v298_v13 }
 0x142   : > { %440 = vst [vmem:[%s203_s8] sm:$0xff] %v439_v15  }
 0x143   : > { %597 = shalt.err (!%p594_p7)
}
 0x144   : > { %s598_s30 = scalar_lea.hbm %s851_s5, 128  ;;  %s602_s10 = scalar_lea.hbm %s898_s3, 256 }
 0x145   : > { %p599_p9 = scmp.ne.s32.totalorder %s851_s5, %s598_s30  ;;  %p603_p5 = scmp.lt.u32.totalorder %s851_s5, %s898_s3 }
 0x146   : > { %p604_p2 = scmp.lt.u32.totalorder %s602_s10, %s598_s30  ;;  %p606_p4 = scmp.lt.u32.totalorder %s598_s30, %s851_s5 }
 0x147   : > { %p600_p1 = pnand %p599_p9, %p779_p12 }
 0x148   : > { %p605_p11 = por %p604_p2, %p603_p5 }
 0x149   : > { %p601_p0 = pneg %p600_p1 }
 0x14a   : > { %p607_p6 = por %p606_p4, %p605_p11 }
 0x14c   : > { %p608_p8 = pnand %p607_p6, %p601_p0 }
 0x14e   : > { %611 = shalt.err (!%p608_p8)
}
 0x14f   : > { %s663_s20 = smov 64   ;;  %s664_s8 = smov 4  }
 0x150   : > { %464 = dma.vmem_to_hbm [thread:$0]  (%p779_p12), %s846_s9, 128, %s851_s5, %s311_s27, %s663_s20, %s663_s20, %s664_s8  }
 0x151 PF: > { %s339_s4 = sand.u32 1, %s642_s12   ;;  %p913_p10 = scmp.ne.s32.totalorder %s903_s19, 0 }
 0x152   : > { %p914_p13 = scmp.ge.s32.totalorder %s654_s15, 2  ;;  %s340_s25 = scalar_lea.sflag [#allocation4], %s339_s4 }
 0x154   : > { %p475_p3 = pnand %p914_p13, %p913_p10 }
 0x156   : > { %637 = dma.done.wait (!%p475_p3), %s340_s25, 128  }
 0x157   : > { %639 = vsyncadd (!%p475_p3), %s340_s25, 4294967168  ;;  %p17_p7 = scmp.ge.s32.totalorder %s741_s24, 4   ;;  %s915_s12 = smov %s646_s13 }
 0x158   : > { %s916_s13 = smov %s650_s14  ;;  %s917_s14 = smov %s775_s17 }
 0x159   : > { %s918_s15 = smov %s741_s24  ;;  %19 = sbr.rel (!%p17_p7) target bundleno = 6 (0x6), region = 81 }
 0x160   :  { %345 = vsyncpa [#allocation3], 1 }
 0x161   :  { %347 = vsyncpa [#allocation3 + $0x1], 1 }
 0x162   :  { %348 = vsyncpa [#allocation6], 1 }
 0x163   :  { %349 = vsyncpa [#allocation4], 1 }
 0x164   :  { %351 = vsyncpa [#allocation4 + $0x1], 1 }

</bundles_post_ra>
